<compile_context>
chip_gen: v6e
topology: v6e:2x2x1
jax: 0.10.0
libtpu: 0.0.40
codegen_flags: <defaults>
</compile_context>

<pallas_src>
import jax
import jax.numpy as jnp
from jax.experimental import pallas as pl
from jax.experimental.pallas import tpu as pltpu


def _round_up(x, m):
    return ((x + m - 1) // m) * m


def _vmem_cap_bytes():
    try:
        return int(pltpu.get_tpu_info().vmem_capacity_bytes)
    except Exception:
        return 64 * 1024 * 1024          # conservative fallback (v7x-sized)


def _default_vmem_budget():
    cap = _vmem_cap_bytes()
    # ~60% of physical VMEM for the resident table path, capped so v5e/v6e
    # (128 MiB) get a big budget while v7x (64 MiB) stays safe.
    return max(16 * 1024 * 1024, min(int(cap * 0.6), 80 * 1024 * 1024))


# ---------------------------------------------------------------------------
# Path A: table VMEM-resident (fetched once), gather via exact one-hot matmul
# ---------------------------------------------------------------------------
def _resident_gather_kernel(idx_ref, table_ref, out_ref):
    # idx_ref:   (TB, 1) int32  -- block of token ids
    # table_ref: (V, D)         -- full embedding table (resident, fetched once)
    # out_ref:   (TB, D)        -- gathered embeddings for this token block
    ids = idx_ref[...]                                   # (TB, 1)
    tb = ids.shape[0]
    v = table_ref.shape[0]
    onehot = (ids == jax.lax.broadcasted_iota(jnp.int32, (tb, v), 1))
    onehot = onehot.astype(table_ref.dtype)              # exact 0/1 entries
    out_ref[...] = jnp.dot(onehot, table_ref[...],
                           preferred_element_type=jnp.float32
                           ).astype(out_ref.dtype)


# ---------------------------------------------------------------------------
# Path B: scalar-prefetch DMA row-gather (table stays in HBM)
# ---------------------------------------------------------------------------
def _dma_gather_kernel(idx_ref, table_hbm, out_ref, row_buf, sem):
    # idx_ref:   (N_pad,) int32 in SMEM  (scalar prefetch)
    # table_hbm: (V, D) ref in HBM       (memory_space=pl.ANY)
    # out_ref:   (TB, D) VMEM output block
    # row_buf:   (TB, D) VMEM staging buffer
    # sem:       DMA semaphore
    i = pl.program_id(0)
    tb = out_ref.shape[0]
    base = i * tb

    def _start(t, carry):
        row = idx_ref[base + t]
        pltpu.make_async_copy(table_hbm.at[row], row_buf.at[t], sem).start()
        return carry

    jax.lax.fori_loop(0, tb, _start, 0)

    def _wait(t, carry):
        # All row copies have identical size, so waiting TB times on the same
        # semaphore with a same-shaped descriptor drains them all.
        pltpu.make_async_copy(table_hbm.at[0], row_buf.at[0], sem).wait()
        return carry

    jax.lax.fori_loop(0, tb, _wait, 0)

    out_ref[...] = row_buf[...]


# ---------------------------------------------------------------------------
# Wrapper
# ---------------------------------------------------------------------------
def embedding_coder_forward(x, table, *, token_block=256,
                            vmem_budget_bytes=None, vmem_limit_bytes=None):
    """Pallas equivalent of EmbeddingCoder.forward: table[x].

    x:     integer array of any shape (e.g. (B, S))
    table: (num_embeddings, output_dim) float array
    returns: x.shape + (output_dim,)
    """
    v, d = table.shape
    orig_shape = x.shape
    itemsize = jnp.dtype(table.dtype).itemsize

    flat = x.reshape(-1).astype(jnp.int32)
    flat = jnp.clip(flat, 0, v - 1)          # clamp OOB ids (PyTorch would raise)
    n = int(flat.shape[0])

    if vmem_budget_bytes is None:
        vmem_budget_bytes = _default_vmem_budget()
    cap = _vmem_cap_bytes()

    # --- token block: give the (parallel) token axis >= 2 blocks when N
    # allows, so v7x's two TensorCores are both fed -------------------------
    tb_target = max(8, _round_up(token_block, 8))
    n8 = _round_up(max(n, 1), 8)
    if n8 >= 2 * tb_target:
        tb = tb_target
    elif n8 > 8:
        tb = max(8, _round_up(-(-n8 // 2), 8))     # split small N into ~2 blocks
    else:
        tb = 8
    n_pad = _round_up(n, tb)
    if n_pad != n:
        flat = jnp.pad(flat, (0, n_pad - n))       # padded ids -> row 0, sliced off
    grid = (n_pad // tb,)

    # --- honest VMEM accounting for the resident-table path -----------------
    resident_need = (
        2 * v * d * itemsize          # table block (conservatively double-buffered)
        + 2 * tb * d * itemsize       # double-buffered output block
        + 2 * tb * 4                  # double-buffered ids block
        + tb * v * (4 + itemsize)     # iota (int32) + one-hot (table dtype) temps
        + tb * d * 4                  # f32 matmul result before the cast
    )
    use_resident = resident_need <= vmem_budget_bytes

    if use_resident:
        if vmem_limit_bytes is None:
            limit = max(32 * 1024 * 1024,
                        min(resident_need + 8 * 1024 * 1024,
                            cap - 16 * 1024 * 1024))
        else:
            limit = vmem_limit_bytes

        out_padded = pl.pallas_call(
            _resident_gather_kernel,
            out_shape=jax.ShapeDtypeStruct((n_pad, d), table.dtype),
            grid_spec=pltpu.PrefetchScalarGridSpec(
                num_scalar_prefetch=0,
                grid=grid,
                in_specs=[
                    pl.BlockSpec((tb, 1), lambda i: (i, 0)),   # token ids
                    pl.BlockSpec((v, d), lambda i: (0, 0)),    # whole table, fetched once
                ],
                out_specs=pl.BlockSpec((tb, d), lambda i: (i, 0)),
            ),
            compiler_params=pltpu.CompilerParams(
                dimension_semantics=("parallel",),
                vmem_limit_bytes=int(limit),
            ),
        )(flat.reshape(n_pad, 1), table)
    else:
        limit = int(vmem_limit_bytes) if vmem_limit_bytes is not None \
            else 32 * 1024 * 1024
        out_padded = pl.pallas_call(
            _dma_gather_kernel,
            out_shape=jax.ShapeDtypeStruct((n_pad, d), table.dtype),
            grid_spec=pltpu.PrefetchScalarGridSpec(
                num_scalar_prefetch=1,                        # ids -> SMEM
                grid=grid,
                in_specs=[pl.BlockSpec(memory_space=pl.ANY)],  # table stays in HBM
                out_specs=pl.BlockSpec((tb, d), lambda i, ids: (i, 0)),
                scratch_shapes=[
                    pltpu.VMEM((tb, d), table.dtype),
                    pltpu.SemaphoreType.DMA,
                ],
            ),
            compiler_params=pltpu.CompilerParams(
                dimension_semantics=("parallel",),
                vmem_limit_bytes=limit,
            ),
        )(flat, table)

    out = out_padded[:n, :]
    return out.reshape(*orig_shape, d)


if __name__ == "__main__":
    key = jax.random.PRNGKey(0)
    k_idx, k_tbl, k_idx2, k_tbl2 = jax.random.split(key, 4)

    # ---- case 1: module-sized config (num_embeddings=16, output_dim=32) ----
    # exercises Path A (VMEM-resident table, one-hot MXU gather)
    num_embeddings = 16
    output_dim = 32
    B, S = 2, 8

    table = jax.random.normal(k_tbl, (num_embeddings, output_dim),
                              dtype=jnp.float32)
    x = jax.random.randint(k_idx, (B, S), 0, num_embeddings, dtype=jnp.int32)

    out = embedding_coder_forward(x, table)
    out = jax.block_until_ready(out)

    ref = table[x]
    assert out.shape == (B, S, output_dim), out.shape
    assert jnp.allclose(out, ref, atol=1e-6), "mismatch vs reference gather"

    # ---- case 2: force the scalar-prefetch DMA row-gather path (Path B) ----
    V2, D2, N2 = 640, 32, 700
    table2 = jax.random.normal(k_tbl2, (V2, D2), dtype=jnp.float32)
    x2 = jax.random.randint(k_idx2, (N2,), 0, V2, dtype=jnp.int32)
    out2 = embedding_coder_forward(x2, table2, token_block=256,
                                   vmem_budget_bytes=64 * 1024)
    out2 = jax.block_until_ready(out2)
    ref2 = table2[x2]
    assert out2.shape == (N2, D2), out2.shape
    assert jnp.allclose(out2, ref2, atol=1e-6), "mismatch on DMA-gather path"

    print("KERNEL_OK")
</pallas_src>

<mosaic_0001>
module attributes {stable_mosaic.version = 11 : i64} {
  func.func @_resident_gather_kernel(%arg0: i32, %arg1: memref<8x1xi32, #tpu.memory_space<vmem>>, %arg2: memref<16x32xf32, #tpu.memory_space<vmem>>, %arg3: memref<8x32xf32, #tpu.memory_space<vmem>>) attributes {dimension_semantics = [#tpu.dimension_semantics<parallel>], iteration_bounds = array<i64: 2>, scalar_prefetch = 0 : i64, scratch_operands = 0 : i64, tpu.core_type = #tpu.core_type<tc>, window_params = [{transform_indices = @transform_0, window_bounds = array<i64: 8, 1>}, {pipeline_mode = #tpu.pipeline_mode<synchronous>, transform_indices = @transform_1, window_bounds = array<i64: 16, 32>}, {transform_indices = @transform_2, window_bounds = array<i64: 8, 32>}]} {
    %c0 = arith.constant 0 : index
    %c0_0 = arith.constant 0 : index
    %0 = vector.load %arg1[%c0, %c0_0] : memref<8x1xi32, #tpu.memory_space<vmem>>, vector<8x1xi32>
    %1 = tpu.iota {dimensions = array<i32: 1>} : vector<8x16xi32>
    %2 = vector.broadcast %0 : vector<8x1xi32> to vector<8x16xi32>
    %3 = arith.cmpi eq, %2, %1 : vector<8x16xi32>
    %4 = arith.extui %3 : vector<8x16xi1> to vector<8x16xi32>
    %5 = arith.sitofp %4 : vector<8x16xi32> to vector<8x16xf32>
    %c0_1 = arith.constant 0 : index
    %c0_2 = arith.constant 0 : index
    %6 = vector.load %arg2[%c0_1, %c0_2] : memref<16x32xf32, #tpu.memory_space<vmem>>, vector<16x32xf32>
    %cst = arith.constant dense<0.000000e+00> : vector<8x32xf32>
    %7 = tpu.matmul %5, %6, %cst {dimension_numbers = #tpu.dot_dimension_numbers<[1], [0], [0], [1], [0, 0, 1, 1], [], []>} : vector<8x16xf32>, vector<16x32xf32>, vector<8x32xf32> -> vector<8x32xf32>
    %c0_3 = arith.constant 0 : index
    %c0_4 = arith.constant 0 : index
    %8 = vector.load %arg3[%c0_3, %c0_4] : memref<8x32xf32, #tpu.memory_space<vmem>>, vector<8x32xf32>
    tpu.vector_store %arg3[%c0_3, %c0_4], %7 {strides = array<i32>} : memref<8x32xf32, #tpu.memory_space<vmem>>, vector<8x32xf32>,
    return
  }
  func.func @transform_0(%arg0: i32) -> (i32, i32) {
    %c0_i32 = arith.constant 0 : i32
    %c0_i32_0 = arith.constant 0 : i32
    return %arg0, %c0_i32 : i32, i32
  }
  func.func @transform_1(%arg0: i32) -> (i32, i32) {
    %c0_i32 = arith.constant 0 : i32
    %c0_i32_0 = arith.constant 0 : i32
    %c0_i32_1 = arith.constant 0 : i32
    return %c0_i32, %c0_i32_0 : i32, i32
  }
  func.func @transform_2(%arg0: i32) -> (i32, i32) {
    %c0_i32 = arith.constant 0 : i32
    %c0_i32_0 = arith.constant 0 : i32
    return %arg0, %c0_i32 : i32, i32
  }
}

</mosaic_0001>

<bundles_post_ra>
// kernel: tpu_custom_call.1
= control target key start
LH: loop header
LB: loop body
LE: loop exit
PB: predicated region body
PF: predicated region fallthrough
CT: control target
= control target key end

     0   :  { %7 = vsyncpa [#allocation3], 0  ;;  %s550_s0 = inlined_call_operand.vmem [shape: s32[16,1], index: 0, kind: input, shape index: {}]   ;;  %s551_s1 = inlined_call_operand.vmem [shape: f32[16,32], index: 1, kind: input, shape index: {}]   ;;  %s552_s2 = inlined_call_operand.hbm [shape: f32[16,32], index: 2, kind: output, shape index: {}]  }
   0x1   :  { %9 = vsyncpa [#allocation3 + $0x1], 0  ;;  %s445_s9 = smov 0   ;;  %s447_s10 = smov 0  }
   0x2   :  { %s449_s11 = smov 0   ;;  %s451_s12 = smov 0  }
   0x3 LB: > { %s466_s13 = sadd.s32 4294967295, %s424_s12   ;;  %s299_s14 = sadd.s32 4294967294, %s424_s12   ;;  %s424_s12 = sphi %s451_s12, %s558_s12   ;;  %s420_s11 = sphi %s449_s11, %s557_s11   ;;  %s416_s10 = sphi %s447_s10, %s556_s10   ;;  %s412_s9 = sphi %s445_s9, %s555_s9  }
   0x4   : > { %s470_s15 = sadd.s32 1, %s424_s12   ;;  %s69_s16 = sadd.s32 1, %s420_s11 }
   0x5   : > { %s66_s17 = ssub.s32 %s424_s12, %s470_s15  ;;  %p79_p0 = scmp.ne.s32.totalorder %s420_s11, %s416_s10 }
   0x6   : > { %p67_p1 = scmp.eq.s32.totalorder %s66_s17, 0  ;;  %p80_p2 = scmp.eq.s32.totalorder %s466_s13, 1 }
   0x7   : > { %p85_p3 = scmp.ne.s32.totalorder %s416_s10, %s412_s9  ;;  %p86_p4 = scmp.eq.s32.totalorder %s299_s14, 1 }
   0x8   : > { %s481_s18 = scalar_select %p67_p1, %s420_s11, %s69_s16  }
   0x9   : > { %p483_p5 = por %p80_p2, %p79_p0  ;;  %p487_p6 = por %p86_p4, %p85_p3 }
   0xa   : > { %p302_p7 = scmp.ge.s32.totalorder %s424_s12, 1  ;;  %p114_p8 = scmp.lt.s32.totalorder %s424_s12, 3 }
   0xc   : > { %p115_p9 = pnand %p302_p7, %p114_p8 }
   0xd   : > { %p135_p10 = scmp.lt.s32.totalorder (!%p115_p9), %s466_s13, 1  ;;  %s132_s30 = sand.u32 (!%p115_p9), 1, %s416_s10  }
   0xe   : > { %118 = sbr.rel (%p115_p9) target bundleno = 357 (0x165), region = 28  ;;  %s303_s3 = sshll.u32 (!%p115_p9), %s132_s30, 3 }
   0xf   : > { %s308_s4 = sshll.u32 (!%p115_p9), %s466_s13, 7  ;;  %s134_s5 = scalar_lea.vmem (!%p115_p9), [#allocation2], %s303_s3 }
  0x10   : > { %s240_s6 = sshll.u32 (!%p115_p9), %s134_s5, 4  ;;  %s509_s14 = scalar_lea.hbm (!%p115_p9), %s552_s2, %s308_s4  ;;  %s511_s6 = int_to_ptr.vmem [resolvable:$true] %s240_s6 }
  0x11   : > { %s227_s16 = scalar_lea.sflag (!%p115_p9), [#allocation3], %s132_s30  ;;  %s364_s17 = scalar_lea.vmem (!%p115_p9), %s511_s6, 128 }
  0x12   : > { %p365_p11 = scmp.ne.s32.totalorder (!%p115_p9), %s511_s6, %s364_s17 }
  0x13   : > { %v149_v0 = vld [vmem:[%s551_s1 + $0x8] sm:$0xff]  ;;  %v426_v1 = vmov 0   ;;  %v427_v2 = vmov 0.0   ;;  %s136_s23 = scalar_select %p135_p10, %s466_s13, 1  ;;  %v148_v3 = vld [vmem:[%s551_s1] sm:$0xff]  ;;  %vm428_vm0 = vmmov 0   ;;  %v140_v5 = vlaneseq }
  0x14   : > { %363 = vset.pattern.permute.xlu0 %v426_v1  ;;  %314 = vmatprep.subr.mxu0 %v427_v2  ;;  %vm150_vm1 = vcmask 130048   ;;  %vm224_vm3 = vcmask 261120   ;;  %p366_p12 = pnand %p365_p11, %p483_p5  ;;  %s429_s13 = smov [#allocation2]  }
  0x15   : > { %315 = vmatpush3.msra.mxu0 %v149_v0  ;;  %s304_s26 = sshll.u32 %s136_s23, 3  ;;  %318 = vmatprep.mubr.msk.f32.mxu0 %vm428_vm0, %v427_v2  ;;  %v141_v6 = vand.u32 127, %v140_v5  ;;  %s368_s21 = sshll.u32 %s429_s13, 4  ;;  %s369_s21 = int_to_ptr.vmem [resolvable:$false] %s368_s21 }
  0x16   : > { %316 = vmatprep.subr.mxu0 %v427_v2  ;;  %s138_s29 = scalar_lea.vmem %s550_s0, %s304_s26  ;;  %p367_p13 = pneg %p366_p12 }
  0x17   : > { %317 = vmatpush3.msra.mxu0 %v148_v3  ;;  %v139_v4 = vld [vmem:[%s138_s29] sm:$0xff]  ;;  %s370_s22 = scalar_lea.vmem %s369_s21, 256  ;;  %p371_p0 = scmp.lt.s32.totalorder %s511_s6, %s369_s21 }
  0x18   : > { %143 = vperm.xlu0 %363, %v139_v4   ;;  %p372_p1 = scmp.lt.s32.totalorder %s370_s22, %s364_s17 }
  0x1a   : > { %p373_p2 = por %p372_p1, %p371_p0 }
  0x1c   : > { %p374_p3 = pnand %p373_p2, %p367_p13 }
  0x93   : > { %v144_v7 = vpop.permute.xlu0 %143 }
  0x94   : > { %vm145_vm2 = vcmp.eq.s32.totalorder %v144_v7, %v141_v6 }
  0x95   : > { %v305_v8 = vsel %vm145_vm2, 1.0, %v427_v2 }
  0x96   : > { %319 = vmatmul.mubr.msk.f32.vlgmr.msra.gmra.mxu0 %vm150_vm1, %v305_v8 }
 0x156   : > { %v220_v9 = vpop.f32.mrf.mxu0 }
 0x157   : > { %225 = vst.msk [vmem:[%s134_s5] sm:$0xff] %vm224_vm3, %v220_v9 }
 0x158   : > { %v320_v10 = vpop.f32.mrf.mxu0 }
 0x159   : > { %377 = shalt.err (!%p374_p3)
}
 0x15a   : > { %s378_s23 = scalar_lea.hbm %s509_s14, 128  ;;  %s382_s26 = scalar_lea.hbm %s552_s2, 256 }
 0x15b   : > { %p379_p4 = scmp.ne.s32.totalorder %s509_s14, %s378_s23  ;;  %p383_p9 = scmp.lt.s32.totalorder %s509_s14, %s552_s2 }
 0x15c   : > { %p384_p10 = scmp.lt.s32.totalorder %s382_s26, %s378_s23 }
 0x15d   : > { %p380_p7 = pnand %p379_p4, %p483_p5 }
 0x15e   : > { %p385_p11 = por %p384_p10, %p383_p9 }
 0x15f   : > { %p381_p8 = pneg %p380_p7 }
 0x161   : > { %p386_p12 = pnand %p385_p11, %p381_p8 }
 0x163   : > { %389 = shalt.err (!%p386_p12)
}
 0x164   : > { %321 = dma.vmem_to_hbm [thread:$0]  (%p483_p5), %s511_s6, 128, %s509_s14, %s227_s16  }
 0x165 PF: > { %p327_p13 = scmp.ge.s32.totalorder %s424_s12, 2  ;;  %s252_s29 = sand.u32 1, %s412_s9  }
 0x166   : > { %s253_s30 = scalar_lea.sflag [#allocation3], %s252_s29 }
 0x167   : > { %p324_p0 = pnand %p327_p13, %p487_p6 }
 0x169   : > { %p325_p1 = pneg %p324_p0 }
 0x16b   : > { %407 = dma.done.wait (%p325_p1), %s253_s30, 128  }
 0x16c   : > { %409 = vsyncadd (%p325_p1), %s253_s30, 4294967168  ;;  %p12_p2 = scmp.ge.s32.totalorder %s470_s15, 4   ;;  %s555_s9 = smov %s416_s10 }
 0x16d   : > { %s556_s10 = smov %s420_s11  ;;  %s557_s11 = smov %s481_s18 }
 0x16e   : > { %s558_s12 = smov %s470_s15  ;;  %14 = sbr.rel (!%p12_p2) target bundleno = 3 (0x3), region = 63 }
 0x173   :  { %258 = vsyncpa [#allocation3], 1 }
 0x174   :  { %260 = vsyncpa [#allocation3 + $0x1], 1 }

</bundles_post_ra>
